<compile_context>
chip_gen: v5e
topology: v5e:2x2
jax: 0.10.0
libtpu: 0.0.40
codegen_flags: <defaults>
</compile_context>

<pallas_src>
import functools

import jax
import jax.numpy as jnp
from jax.experimental import pallas as pl
from jax.experimental.pallas import tpu as pltpu

_VMEM_LIMIT = 64 * 1024 * 1024


# ---------------------------------------------------------------------------
# Kernels
# ---------------------------------------------------------------------------

def gcn_layer_kernel(a_ref, h_ref, w_ref, b_ref, out_ref, *, apply_relu):
    """One GCN layer for a row tile of nodes: act((A_tile @ H) @ W + b).

    a_ref : [TM, N]      bf16  streamed row tile of normalized adjacency
    h_ref : [N, d_in]    bf16  full previous-layer features (VMEM resident)
    w_ref : [d_in, d_out] f32  pinned weights
    b_ref : [1, d_out]    f32  pinned bias
    """
    agg = jnp.dot(a_ref[...], h_ref[...], preferred_element_type=jnp.float32)
    z = jnp.dot(agg, w_ref[...], preferred_element_type=jnp.float32) + b_ref[...]
    if apply_relu:
        z = jnp.maximum(z, 0.0)
    out_ref[...] = z.astype(out_ref.dtype)


def gcn_final_kernel(a_ref, h_ref, w3_ref, b3_ref, wl_ref, bl_ref, out_ref):
    """GCNConv3 (no relu) + Linear + log_softmax for a row tile of nodes.

    The class dimension is padded to a lane-dense multiple of 128; padded
    logit columns carry a -1e30 bias so they contribute nothing to softmax.
    """
    agg = jnp.dot(a_ref[...], h_ref[...], preferred_element_type=jnp.float32)
    h3 = jnp.dot(agg, w3_ref[...], preferred_element_type=jnp.float32) + b3_ref[...]
    z = jnp.dot(h3, wl_ref[...], preferred_element_type=jnp.float32) + bl_ref[...]
    m = jnp.max(z, axis=1, keepdims=True)
    zs = z - m
    lse = jnp.log(jnp.sum(jnp.exp(zs), axis=1, keepdims=True))
    out_ref[...] = zs - lse


# ---------------------------------------------------------------------------
# Tiling / pallas_call wrappers
# ---------------------------------------------------------------------------

def _pad_and_tile(n):
    """Pick row tile TM (multiple of 16) and padded node count N_pad = k*TM.

    Keeps the double-buffered bf16 A_hat row tile under ~16 MiB so the pipeline
    fits comfortably inside scoped VMEM on v5e/v6e (128 MiB) and v7x (64 MiB).
    """
    n16 = ((n + 15) // 16) * 16
    cap = max(16, (4 * 1024 * 1024) // n16)     # 2 bufs * TM * N * 2B <= 16 MiB
    tm = max(16, (min(512, n16, cap) // 16) * 16)
    n_pad = ((n16 + tm - 1) // tm) * tm
    return n_pad, tm


def _gcn_layer(a_pad, h_pad, w, b, *, apply_relu, tm, out_dtype):
    n_pad = a_pad.shape[0]
    d_in = h_pad.shape[1]
    d_out = w.shape[1]
    kernel = functools.partial(gcn_layer_kernel, apply_relu=apply_relu)
    return pl.pallas_call(
        kernel,
        out_shape=jax.ShapeDtypeStruct((n_pad, d_out), out_dtype),
        grid_spec=pltpu.PrefetchScalarGridSpec(
            num_scalar_prefetch=0,
            grid=(n_pad // tm,),
            in_specs=[
                pl.BlockSpec((tm, n_pad), lambda i: (i, 0)),    # stream A row tiles
                pl.BlockSpec((n_pad, d_in), lambda i: (0, 0)),  # H resident
                pl.BlockSpec((d_in, d_out), lambda i: (0, 0)),  # W pinned
                pl.BlockSpec((1, d_out), lambda i: (0, 0)),     # b pinned
            ],
            out_specs=pl.BlockSpec((tm, d_out), lambda i: (i, 0)),
        ),
        compiler_params=pltpu.CompilerParams(
            dimension_semantics=("parallel",),
            vmem_limit_bytes=_VMEM_LIMIT),
    )(a_pad, h_pad, w, b)


def _gcn_final(a_pad, h_pad, w3, b3, wl_pad, bl_pad, *, tm):
    n_pad = a_pad.shape[0]
    d_in = h_pad.shape[1]
    d_mid = w3.shape[1]
    c_pad = wl_pad.shape[1]
    return pl.pallas_call(
        gcn_final_kernel,
        out_shape=jax.ShapeDtypeStruct((n_pad, c_pad), jnp.float32),
        grid_spec=pltpu.PrefetchScalarGridSpec(
            num_scalar_prefetch=0,
            grid=(n_pad // tm,),
            in_specs=[
                pl.BlockSpec((tm, n_pad), lambda i: (i, 0)),
                pl.BlockSpec((n_pad, d_in), lambda i: (0, 0)),
                pl.BlockSpec((d_in, d_mid), lambda i: (0, 0)),
                pl.BlockSpec((1, d_mid), lambda i: (0, 0)),
                pl.BlockSpec((d_mid, c_pad), lambda i: (0, 0)),
                pl.BlockSpec((1, c_pad), lambda i: (0, 0)),
            ],
            out_specs=pl.BlockSpec((tm, c_pad), lambda i: (i, 0)),
        ),
        compiler_params=pltpu.CompilerParams(
            dimension_semantics=("parallel",),
            vmem_limit_bytes=_VMEM_LIMIT),
    )(a_pad, h_pad, w3, b3, wl_pad, bl_pad)


# ---------------------------------------------------------------------------
# Plain-JAX glue (graph normalization, params, forward)
# ---------------------------------------------------------------------------

def gcn_normalized_adjacency(edge_index, num_nodes):
    """Dense D^-1/2 (A + I) D^-1/2 matching PyG gcn_norm (add_self_loops=True)."""
    src, dst = edge_index[0], edge_index[1]
    a = jnp.zeros((num_nodes, num_nodes), jnp.float32)
    a = a.at[dst, src].set(1.0)                                          # src -> dst
    a = a.at[jnp.arange(num_nodes), jnp.arange(num_nodes)].set(1.0)      # self loops
    deg = jnp.sum(a, axis=1)
    dinv = jnp.where(deg > 0, jax.lax.rsqrt(deg), 0.0)
    return dinv[:, None] * a * dinv[None, :]


def init_params(key, num_features, dim=16, num_classes=1):
    ks = jax.random.split(key, 8)

    def glorot(k, fan_in, fan_out):
        s = jnp.sqrt(6.0 / (fan_in + fan_out))
        return jax.random.uniform(k, (fan_in, fan_out), jnp.float32, -s, s)

    return dict(
        w1=glorot(ks[0], num_features, dim), b1=jnp.zeros((1, dim), jnp.float32),
        w2=glorot(ks[1], dim, dim),          b2=jnp.zeros((1, dim), jnp.float32),
        w3=glorot(ks[2], dim, dim),          b3=jnp.zeros((1, dim), jnp.float32),
        wl=glorot(ks[3], dim, num_classes),
        bl=jax.random.uniform(ks[4], (1, num_classes), jnp.float32,
                              -1.0 / jnp.sqrt(dim), 1.0 / jnp.sqrt(dim)),
    )


@jax.jit
def net_forward(x, a_hat, params):
    n, _ = x.shape
    c = params["wl"].shape[1]
    n_pad, tm = _pad_and_tile(n)
    c_pad = ((c + 127) // 128) * 128

    pad_n = n_pad - n
    a_pad = jnp.pad(a_hat.astype(jnp.bfloat16), ((0, pad_n), (0, pad_n)))
    x_pad = jnp.pad(x.astype(jnp.bfloat16), ((0, pad_n), (0, 0)))

    # Lane-dense class dimension: pad the Linear layer; padded logits get a very
    # negative bias so they vanish under log_softmax, then get sliced away.
    wl_pad = jnp.pad(params["wl"], ((0, 0), (0, c_pad - c)))
    bl_pad = jnp.pad(params["bl"], ((0, 0), (0, c_pad - c)), constant_values=-1e30)

    # conv1: relu((A @ X) @ W1 + b1)   (aggregate first: F <= dim)
    h1 = _gcn_layer(a_pad, x_pad, params["w1"], params["b1"],
                    apply_relu=True, tm=tm, out_dtype=jnp.bfloat16)
    # conv2: relu((A @ H1) @ W2 + b2)
    h2 = _gcn_layer(a_pad, h1, params["w2"], params["b2"],
                    apply_relu=True, tm=tm, out_dtype=jnp.bfloat16)
    # F.dropout(x, training=self.training): identity in eval mode.
    # TODO(synk): add stochastic dropout via pltpu.prng_* for training-mode parity.
    # conv3 (no relu) + Linear + log_softmax, fused.
    out_pad = _gcn_final(a_pad, h2, params["w3"], params["b3"], wl_pad, bl_pad, tm=tm)
    return out_pad[:n, :c]


# ---------------------------------------------------------------------------
# Demo
# ---------------------------------------------------------------------------

if __name__ == "__main__":
    key = jax.random.PRNGKey(0)
    k_x, k_p = jax.random.split(key)

    num_nodes = 16
    num_features = 8
    dim = 16
    num_classes = 1   # module default

    # Deterministic node features and a small ring-shaped undirected graph.
    x = jax.random.normal(k_x, (num_nodes, num_features), jnp.float32)
    src = jnp.arange(num_nodes, dtype=jnp.int32)
    dst = (src + 1) % num_nodes
    edge_index = jnp.stack(
        [jnp.concatenate([src, dst]), jnp.concatenate([dst, src])], axis=0)  # [2, 2N]

    a_hat = gcn_normalized_adjacency(edge_index, num_nodes)
    params = init_params(k_p, num_features, dim, num_classes)

    out = net_forward(x, a_hat, params)
    jax.block_until_ready(out)
    assert out.shape == (num_nodes, num_classes)
    assert bool(jnp.all(jnp.isfinite(out)))
    print("KERNEL_OK")
</pallas_src>

<mosaic_0001>
module attributes {stable_mosaic.version = 11 : i64} {
  func.func @gcn_layer_kernel(%arg0: i32, %arg1: memref<16x16xbf16, #tpu.memory_space<vmem>>, %arg2: memref<16x16xbf16, #tpu.memory_space<vmem>>, %arg3: memref<16x16xf32, #tpu.memory_space<vmem>>, %arg4: memref<1x16xf32, #tpu.memory_space<vmem>>, %arg5: memref<16x16xbf16, #tpu.memory_space<vmem>>) attributes {dimension_semantics = [#tpu.dimension_semantics<parallel>], iteration_bounds = array<i64: 1>, scalar_prefetch = 0 : i64, scratch_operands = 0 : i64, tpu.core_type = #tpu.core_type<tc>, window_params = [{transform_indices = @transform_0, window_bounds = array<i64: 16, 16>}, {pipeline_mode = #tpu.pipeline_mode<synchronous>, transform_indices = @transform_1, window_bounds = array<i64: 16, 16>}, {pipeline_mode = #tpu.pipeline_mode<synchronous>, transform_indices = @transform_2, window_bounds = array<i64: 16, 16>}, {pipeline_mode = #tpu.pipeline_mode<synchronous>, transform_indices = @transform_3, window_bounds = array<i64: 1, 16>}, {transform_indices = @transform_4, window_bounds = array<i64: 16, 16>}]} {
    %c0 = arith.constant 0 : index
    %c0_0 = arith.constant 0 : index
    %0 = vector.load %arg1[%c0, %c0_0] : memref<16x16xbf16, #tpu.memory_space<vmem>>, vector<16x16xbf16>
    %c0_1 = arith.constant 0 : index
    %c0_2 = arith.constant 0 : index
    %1 = vector.load %arg2[%c0_1, %c0_2] : memref<16x16xbf16, #tpu.memory_space<vmem>>, vector<16x16xbf16>
    %cst = arith.constant dense<0.000000e+00> : vector<16x16xf32>
    %2 = tpu.matmul %0, %1, %cst {dimension_numbers = #tpu.dot_dimension_numbers<[1], [0], [0], [1], [0, 0, 1, 1], [], []>} : vector<16x16xbf16>, vector<16x16xbf16>, vector<16x16xf32> -> vector<16x16xf32>
    %c0_3 = arith.constant 0 : index
    %c0_4 = arith.constant 0 : index
    %3 = vector.load %arg3[%c0_3, %c0_4] : memref<16x16xf32, #tpu.memory_space<vmem>>, vector<16x16xf32>
    %cst_5 = arith.constant dense<0.000000e+00> : vector<16x16xf32>
    %4 = tpu.matmul %2, %3, %cst_5 {dimension_numbers = #tpu.dot_dimension_numbers<[1], [0], [0], [1], [0, 0, 1, 1], [], []>} : vector<16x16xf32>, vector<16x16xf32>, vector<16x16xf32> -> vector<16x16xf32>
    %c0_6 = arith.constant 0 : index
    %c0_7 = arith.constant 0 : index
    %5 = vector.load %arg4[%c0_6, %c0_7] : memref<1x16xf32, #tpu.memory_space<vmem>>, vector<1x16xf32>
    %6 = vector.broadcast %5 : vector<1x16xf32> to vector<16x16xf32>
    %7 = arith.addf %4, %6 : vector<16x16xf32>
    %cst_8 = arith.constant 0.000000e+00 : f32
    %8 = vector.broadcast %cst_8 : f32 to vector<16x16xf32>
    %9 = arith.maximumf %7, %8 : vector<16x16xf32>
    %10 = arith.truncf %9 : vector<16x16xf32> to vector<16x16xbf16>
    %c0_9 = arith.constant 0 : index
    %c0_10 = arith.constant 0 : index
    %11 = vector.load %arg5[%c0_9, %c0_10] : memref<16x16xbf16, #tpu.memory_space<vmem>>, vector<16x16xbf16>
    tpu.vector_store %arg5[%c0_9, %c0_10], %10 {strides = array<i32>} : memref<16x16xbf16, #tpu.memory_space<vmem>>, vector<16x16xbf16>,
    return
  }
  func.func @transform_0(%arg0: i32) -> (i32, i32) {
    %c0_i32 = arith.constant 0 : i32
    %c0_i32_0 = arith.constant 0 : i32
    return %arg0, %c0_i32 : i32, i32
  }
  func.func @transform_1(%arg0: i32) -> (i32, i32) {
    %c0_i32 = arith.constant 0 : i32
    %c0_i32_0 = arith.constant 0 : i32
    %c0_i32_1 = arith.constant 0 : i32
    return %c0_i32, %c0_i32_0 : i32, i32
  }
  func.func @transform_2(%arg0: i32) -> (i32, i32) {
    %c0_i32 = arith.constant 0 : i32
    %c0_i32_0 = arith.constant 0 : i32
    %c0_i32_1 = arith.constant 0 : i32
    return %c0_i32, %c0_i32_0 : i32, i32
  }
  func.func @transform_3(%arg0: i32) -> (i32, i32) {
    %c0_i32 = arith.constant 0 : i32
    %c0_i32_0 = arith.constant 0 : i32
    %c0_i32_1 = arith.constant 0 : i32
    return %c0_i32, %c0_i32_0 : i32, i32
  }
  func.func @transform_4(%arg0: i32) -> (i32, i32) {
    %c0_i32 = arith.constant 0 : i32
    %c0_i32_0 = arith.constant 0 : i32
    return %arg0, %c0_i32 : i32, i32
  }
}

module attributes {stable_mosaic.version = 11 : i64} {
  func.func @gcn_layer_kernel(%arg0: i32, %arg1: memref<16x16xbf16, #tpu.memory_space<vmem>>, %arg2: memref<16x8xbf16, #tpu.memory_space<vmem>>, %arg3: memref<8x16xf32, #tpu.memory_space<vmem>>, %arg4: memref<1x16xf32, #tpu.memory_space<vmem>>, %arg5: memref<16x16xbf16, #tpu.memory_space<vmem>>) attributes {dimension_semantics = [#tpu.dimension_semantics<parallel>], iteration_bounds = array<i64: 1>, scalar_prefetch = 0 : i64, scratch_operands = 0 : i64, tpu.core_type = #tpu.core_type<tc>, window_params = [{transform_indices = @transform_0, window_bounds = array<i64: 16, 16>}, {pipeline_mode = #tpu.pipeline_mode<synchronous>, transform_indices = @transform_1, window_bounds = array<i64: 16, 8>}, {pipeline_mode = #tpu.pipeline_mode<synchronous>, transform_indices = @transform_2, window_bounds = array<i64: 8, 16>}, {pipeline_mode = #tpu.pipeline_mode<synchronous>, transform_indices = @transform_3, window_bounds = array<i64: 1, 16>}, {transform_indices = @transform_4, window_bounds = array<i64: 16, 16>}]} {
    %c0 = arith.constant 0 : index
    %c0_0 = arith.constant 0 : index
    %0 = vector.load %arg1[%c0, %c0_0] : memref<16x16xbf16, #tpu.memory_space<vmem>>, vector<16x16xbf16>
    %c0_1 = arith.constant 0 : index
    %c0_2 = arith.constant 0 : index
    %1 = vector.load %arg2[%c0_1, %c0_2] : memref<16x8xbf16, #tpu.memory_space<vmem>>, vector<16x8xbf16>
    %cst = arith.constant dense<0.000000e+00> : vector<16x8xf32>
    %2 = tpu.matmul %0, %1, %cst {dimension_numbers = #tpu.dot_dimension_numbers<[1], [0], [0], [1], [0, 0, 1, 1], [], []>} : vector<16x16xbf16>, vector<16x8xbf16>, vector<16x8xf32> -> vector<16x8xf32>
    %c0_3 = arith.constant 0 : index
    %c0_4 = arith.constant 0 : index
    %3 = vector.load %arg3[%c0_3, %c0_4] : memref<8x16xf32, #tpu.memory_space<vmem>>, vector<8x16xf32>
    %cst_5 = arith.constant dense<0.000000e+00> : vector<16x16xf32>
    %4 = tpu.matmul %2, %3, %cst_5 {dimension_numbers = #tpu.dot_dimension_numbers<[1], [0], [0], [1], [0, 0, 1, 1], [], []>} : vector<16x8xf32>, vector<8x16xf32>, vector<16x16xf32> -> vector<16x16xf32>
    %c0_6 = arith.constant 0 : index
    %c0_7 = arith.constant 0 : index
    %5 = vector.load %arg4[%c0_6, %c0_7] : memref<1x16xf32, #tpu.memory_space<vmem>>, vector<1x16xf32>
    %6 = vector.broadcast %5 : vector<1x16xf32> to vector<16x16xf32>
    %7 = arith.addf %4, %6 : vector<16x16xf32>
    %cst_8 = arith.constant 0.000000e+00 : f32
    %8 = vector.broadcast %cst_8 : f32 to vector<16x16xf32>
    %9 = arith.maximumf %7, %8 : vector<16x16xf32>
    %10 = arith.truncf %9 : vector<16x16xf32> to vector<16x16xbf16>
    %c0_9 = arith.constant 0 : index
    %c0_10 = arith.constant 0 : index
    %11 = vector.load %arg5[%c0_9, %c0_10] : memref<16x16xbf16, #tpu.memory_space<vmem>>, vector<16x16xbf16>
    tpu.vector_store %arg5[%c0_9, %c0_10], %10 {strides = array<i32>} : memref<16x16xbf16, #tpu.memory_space<vmem>>, vector<16x16xbf16>,
    return
  }
  func.func @transform_0(%arg0: i32) -> (i32, i32) {
    %c0_i32 = arith.constant 0 : i32
    %c0_i32_0 = arith.constant 0 : i32
    return %arg0, %c0_i32 : i32, i32
  }
  func.func @transform_1(%arg0: i32) -> (i32, i32) {
    %c0_i32 = arith.constant 0 : i32
    %c0_i32_0 = arith.constant 0 : i32
    %c0_i32_1 = arith.constant 0 : i32
    return %c0_i32, %c0_i32_0 : i32, i32
  }
  func.func @transform_2(%arg0: i32) -> (i32, i32) {
    %c0_i32 = arith.constant 0 : i32
    %c0_i32_0 = arith.constant 0 : i32
    %c0_i32_1 = arith.constant 0 : i32
    return %c0_i32, %c0_i32_0 : i32, i32
  }
  func.func @transform_3(%arg0: i32) -> (i32, i32) {
    %c0_i32 = arith.constant 0 : i32
    %c0_i32_0 = arith.constant 0 : i32
    %c0_i32_1 = arith.constant 0 : i32
    return %c0_i32, %c0_i32_0 : i32, i32
  }
  func.func @transform_4(%arg0: i32) -> (i32, i32) {
    %c0_i32 = arith.constant 0 : i32
    %c0_i32_0 = arith.constant 0 : i32
    return %arg0, %c0_i32 : i32, i32
  }
}

module attributes {stable_mosaic.version = 11 : i64} {
  func.func @gcn_final_kernel(%arg0: i32, %arg1: memref<16x16xbf16, #tpu.memory_space<vmem>>, %arg2: memref<16x16xbf16, #tpu.memory_space<vmem>>, %arg3: memref<16x16xf32, #tpu.memory_space<vmem>>, %arg4: memref<1x16xf32, #tpu.memory_space<vmem>>, %arg5: memref<16x128xf32, #tpu.memory_space<vmem>>, %arg6: memref<1x128xf32, #tpu.memory_space<vmem>>, %arg7: memref<16x128xf32, #tpu.memory_space<vmem>>) attributes {dimension_semantics = [#tpu.dimension_semantics<parallel>], iteration_bounds = array<i64: 1>, scalar_prefetch = 0 : i64, scratch_operands = 0 : i64, tpu.core_type = #tpu.core_type<tc>, window_params = [{transform_indices = @transform_0, window_bounds = array<i64: 16, 16>}, {pipeline_mode = #tpu.pipeline_mode<synchronous>, transform_indices = @transform_1, window_bounds = array<i64: 16, 16>}, {pipeline_mode = #tpu.pipeline_mode<synchronous>, transform_indices = @transform_2, window_bounds = array<i64: 16, 16>}, {pipeline_mode = #tpu.pipeline_mode<synchronous>, transform_indices = @transform_3, window_bounds = array<i64: 1, 16>}, {pipeline_mode = #tpu.pipeline_mode<synchronous>, transform_indices = @transform_4, window_bounds = array<i64: 16, 128>}, {pipeline_mode = #tpu.pipeline_mode<synchronous>, transform_indices = @transform_5, window_bounds = array<i64: 1, 128>}, {transform_indices = @transform_6, window_bounds = array<i64: 16, 128>}]} {
    %c0 = arith.constant 0 : index
    %c0_0 = arith.constant 0 : index
    %0 = vector.load %arg1[%c0, %c0_0] : memref<16x16xbf16, #tpu.memory_space<vmem>>, vector<16x16xbf16>
    %c0_1 = arith.constant 0 : index
    %c0_2 = arith.constant 0 : index
    %1 = vector.load %arg2[%c0_1, %c0_2] : memref<16x16xbf16, #tpu.memory_space<vmem>>, vector<16x16xbf16>
    %cst = arith.constant dense<0.000000e+00> : vector<16x16xf32>
    %2 = tpu.matmul %0, %1, %cst {dimension_numbers = #tpu.dot_dimension_numbers<[1], [0], [0], [1], [0, 0, 1, 1], [], []>} : vector<16x16xbf16>, vector<16x16xbf16>, vector<16x16xf32> -> vector<16x16xf32>
    %c0_3 = arith.constant 0 : index
    %c0_4 = arith.constant 0 : index
    %3 = vector.load %arg3[%c0_3, %c0_4] : memref<16x16xf32, #tpu.memory_space<vmem>>, vector<16x16xf32>
    %cst_5 = arith.constant dense<0.000000e+00> : vector<16x16xf32>
    %4 = tpu.matmul %2, %3, %cst_5 {dimension_numbers = #tpu.dot_dimension_numbers<[1], [0], [0], [1], [0, 0, 1, 1], [], []>} : vector<16x16xf32>, vector<16x16xf32>, vector<16x16xf32> -> vector<16x16xf32>
    %c0_6 = arith.constant 0 : index
    %c0_7 = arith.constant 0 : index
    %5 = vector.load %arg4[%c0_6, %c0_7] : memref<1x16xf32, #tpu.memory_space<vmem>>, vector<1x16xf32>
    %6 = vector.broadcast %5 : vector<1x16xf32> to vector<16x16xf32>
    %7 = arith.addf %4, %6 : vector<16x16xf32>
    %c0_8 = arith.constant 0 : index
    %c0_9 = arith.constant 0 : index
    %8 = vector.load %arg5[%c0_8, %c0_9] : memref<16x128xf32, #tpu.memory_space<vmem>>, vector<16x128xf32>
    %cst_10 = arith.constant dense<0.000000e+00> : vector<16x128xf32>
    %9 = tpu.matmul %7, %8, %cst_10 {dimension_numbers = #tpu.dot_dimension_numbers<[1], [0], [0], [1], [0, 0, 1, 1], [], []>} : vector<16x16xf32>, vector<16x128xf32>, vector<16x128xf32> -> vector<16x128xf32>
    %c0_11 = arith.constant 0 : index
    %c0_12 = arith.constant 0 : index
    %10 = vector.load %arg6[%c0_11, %c0_12] : memref<1x128xf32, #tpu.memory_space<vmem>>, vector<1x128xf32>
    %11 = vector.broadcast %10 : vector<1x128xf32> to vector<16x128xf32>
    %12 = arith.addf %9, %11 : vector<16x128xf32>
    %cst_13 = arith.constant dense<0xFF800000> : vector<16xf32>
    %13 = vector.multi_reduction <maximumf>, %12, %cst_13 [1] : vector<16x128xf32> to vector<16xf32>
    %14 = vector.shape_cast %13 : vector<16xf32> to vector<16x1xf32>
    %15 = vector.broadcast %14 : vector<16x1xf32> to vector<16x128xf32>
    %16 = arith.subf %12, %15 : vector<16x128xf32>
    %17 = math.exp %16 : vector<16x128xf32>
    %cst_14 = arith.constant dense<0.000000e+00> : vector<16xf32>
    %18 = vector.multi_reduction <add>, %17, %cst_14 [1] : vector<16x128xf32> to vector<16xf32>
    %19 = vector.shape_cast %18 : vector<16xf32> to vector<16x1xf32>
    %20 = math.log %19 : vector<16x1xf32>
    %21 = vector.broadcast %20 : vector<16x1xf32> to vector<16x128xf32>
    %22 = arith.subf %16, %21 : vector<16x128xf32>
    %c0_15 = arith.constant 0 : index
    %c0_16 = arith.constant 0 : index
    %23 = vector.load %arg7[%c0_15, %c0_16] : memref<16x128xf32, #tpu.memory_space<vmem>>, vector<16x128xf32>
    tpu.vector_store %arg7[%c0_15, %c0_16], %22 {strides = array<i32>} : memref<16x128xf32, #tpu.memory_space<vmem>>, vector<16x128xf32>,
    return
  }
  func.func @transform_0(%arg0: i32) -> (i32, i32) {
    %c0_i32 = arith.constant 0 : i32
    %c0_i32_0 = arith.constant 0 : i32
    return %arg0, %c0_i32 : i32, i32
  }
  func.func @transform_1(%arg0: i32) -> (i32, i32) {
    %c0_i32 = arith.constant 0 : i32
    %c0_i32_0 = arith.constant 0 : i32
    %c0_i32_1 = arith.constant 0 : i32
    return %c0_i32, %c0_i32_0 : i32, i32
  }
  func.func @transform_2(%arg0: i32) -> (i32, i32) {
    %c0_i32 = arith.constant 0 : i32
    %c0_i32_0 = arith.constant 0 : i32
    %c0_i32_1 = arith.constant 0 : i32
    return %c0_i32, %c0_i32_0 : i32, i32
  }
  func.func @transform_3(%arg0: i32) -> (i32, i32) {
    %c0_i32 = arith.constant 0 : i32
    %c0_i32_0 = arith.constant 0 : i32
    %c0_i32_1 = arith.constant 0 : i32
    return %c0_i32, %c0_i32_0 : i32, i32
  }
  func.func @transform_4(%arg0: i32) -> (i32, i32) {
    %c0_i32 = arith.constant 0 : i32
    %c0_i32_0 = arith.constant 0 : i32
    %c0_i32_1 = arith.constant 0 : i32
    return %c0_i32, %c0_i32_0 : i32, i32
  }
  func.func @transform_5(%arg0: i32) -> (i32, i32) {
    %c0_i32 = arith.constant 0 : i32
    %c0_i32_0 = arith.constant 0 : i32
    %c0_i32_1 = arith.constant 0 : i32
    return %c0_i32, %c0_i32_0 : i32, i32
  }
  func.func @transform_6(%arg0: i32) -> (i32, i32) {
    %c0_i32 = arith.constant 0 : i32
    %c0_i32_0 = arith.constant 0 : i32
    return %arg0, %c0_i32 : i32, i32
  }
}

</mosaic_0001>

<bundles_post_ra>
// kernel: net_forward.4
= control target key start
LH: loop header
LB: loop body
LE: loop exit
PB: predicated region body
PF: predicated region fallthrough
CT: control target
= control target key end

     0   :  { %vm33_vm0 = vcmask 130048   ;;  %vm90_vm1 = vcmask 125952   ;;  %s157_s1 = inlined_call_operand.vmem [shape: bf16[16,16], index: 1, kind: input, shape index: {}]   ;;  %s158_s0 = inlined_call_operand.vmem [shape: bf16[16,16], index: 0, kind: input, shape index: {}]   ;;  %s159_s2 = inlined_call_operand.vmem [shape: f32[16,16], index: 2, kind: input, shape index: {}]   ;;  %s160_s3 = inlined_call_operand.vmem [shape: f32[1,16], index: 3, kind: input, shape index: {}]   ;;  %s161_s4 = inlined_call_operand.vmem [shape: bf16[16,16], index: 4, kind: output, shape index: {}]  }
   0x1   :  { %v109_v0 = vld [vmem:[%s157_s1] sm:$0xff]  ;;  %v52_v1 = vld [vmem:[%s159_s2 + $0x8] sm:$0xff] }
   0x2   :  { %v108_v2 = vld [vmem:[%s158_s0] sm:$0xff]  ;;  %77 = vmatpush.msra.mxu1 %v52_v1  ;;  %44 = vmatpush.bf16.msra.mxu0 %v109_v0 }
   0x3   :  { %v51_v3 = vld [vmem:[%s159_s2] sm:$0xff] }
   0x4   :  { %78 = vmatpush.msra.mxu1 %v51_v3  ;;  %v110_v6 = vld [vmem:[%s160_s3] ss:$0 sm:$0xff] }
   0x5   :  { %105 = vmatmul.msk.bf16.vlgmr.msra.gmra.mxu0 %vm33_vm0, %v108_v2 }
  0x82   :  { %v46_v4 = vpop.f32.mrf.mxu0 }
  0x83   :  { %106 = vmatmul.msk.f32.vlgmr.msra.gmra.mxu1 %vm33_vm0, %v46_v4 }
  0x8a   :  { %v48_v5 = vpop.f32.mrf.mxu0 }
  0x8b   :  { %107 = vmatmul.msk.f32.gmra.mxu1 %vm33_vm0, %v48_v5 }
 0x100   :  { %v80_v7 = vpop.f32.mrf.mxu1 }
 0x101   :  { %v81_v8 = vadd.f32 %v110_v6, %v80_v7 }
 0x103   :  { %v86_v9 = vmax.f32 %v81_v8, 0.0 }
 0x105   :  { %v88_v10 = vpack.c.bf16 %v86_v9, %v86_v9 }
 0x107   :  { %91 = vst.msk [vmem:[%s161_s4] sm:$0xf] %vm90_vm1, %v88_v10 }
 0x108   :  { %v83_v11 = vpop.f32.mrf.mxu1 }
 0x109   :  { %v84_v12 = vadd.f32 %v110_v6, %v83_v11 }
 0x10b   :  { %v87_v13 = vmax.f32 %v84_v12, 0.0 }
 0x10d   :  { %v89_v14 = vpack.c.bf16 %v87_v13, %v87_v13 }
 0x10f   :  { %92 = vst.msk [vmem:[%s161_s4 + $0x4] sm:$0xf] %vm90_vm1, %v89_v14 }

// kernel: net_forward.5
= control target key start
LH: loop header
LB: loop body
LE: loop exit
PB: predicated region body
PF: predicated region fallthrough
CT: control target
= control target key end

     0   :  { %vm39_vm0 = vcmask 130048   ;;  %s248_s1 = inlined_call_operand.vmem [shape: bf16[16,16], index: 1, kind: input, shape index: {}]   ;;  %s249_s0 = inlined_call_operand.vmem [shape: bf16[16,16], index: 0, kind: input, shape index: {}]   ;;  %s250_s2 = inlined_call_operand.vmem [shape: f32[16,16], index: 2, kind: input, shape index: {}]   ;;  %s251_s3 = inlined_call_operand.vmem [shape: f32[1,16], index: 3, kind: input, shape index: {}]   ;;  %s252_s5 = inlined_call_operand.vmem [shape: f32[1,128], index: 5, kind: input, shape index: {}]   ;;  %s253_s4 = inlined_call_operand.vmem [shape: f32[16,128], index: 4, kind: input, shape index: {}]   ;;  %s254_s6 = inlined_call_operand.vmem [shape: f32[16,128], index: 6, kind: output, shape index: {}]  }
   0x1   :  { %v167_v0 = vld [vmem:[%s248_s1] sm:$0xff]  ;;  %v58_v1 = vld [vmem:[%s250_s2 + $0x8] sm:$0xff] }
   0x2   :  { %v166_v2 = vld [vmem:[%s249_s0] sm:$0xff]  ;;  %83 = vmatpush.msra.mxu1 %v58_v1  ;;  %50 = vmatpush.bf16.msra.mxu0 %v167_v0  ;;  %v93_v6 = vld [vmem:[%s253_s4 + $0x8] sm:$0xff] }
   0x3   :  { %v57_v3 = vld [vmem:[%s250_s2] sm:$0xff]  ;;  %118 = vmatpush.msra.mxu2 %v93_v6 }
   0x4   :  { %84 = vmatpush.msra.mxu1 %v57_v3  ;;  %v92_v7 = vld [vmem:[%s253_s4] sm:$0xff] }
   0x5   :  { %161 = vmatmul.msk.bf16.vlgmr.msra.gmra.mxu0 %vm39_vm0, %v166_v2  ;;  %119 = vmatpush.msra.mxu2 %v92_v7  ;;  %v168_v8 = vld [vmem:[%s251_s3] ss:$0 sm:$0xff] }
   0x6   :  { %v169_v13 = vld [vmem:[%s252_s5] ss:$0 sm:$0xff] }
  0x82   :  { %v52_v4 = vpop.f32.mrf.mxu0 }
  0x83   :  { %162 = vmatmul.msk.f32.vlgmr.msra.gmra.mxu1 %vm39_vm0, %v52_v4 }
  0x8a   :  { %v54_v5 = vpop.f32.mrf.mxu0 }
  0x8b   :  { %163 = vmatmul.msk.f32.gmra.mxu1 %vm39_vm0, %v54_v5 }
 0x100   :  { %v86_v9 = vpop.f32.mrf.mxu1 }
 0x101   :  { %v87_v10 = vadd.f32 %v168_v8, %v86_v9 }
 0x103   :  { %164 = vmatmul.msk.f32.vlgmr.msra.gmra.mxu2 %vm39_vm0, %v87_v10 }
 0x108   :  { %v89_v11 = vpop.f32.mrf.mxu1 }
 0x109   :  { %v90_v12 = vadd.f32 %v168_v8, %v89_v11 }
 0x10b   :  { %165 = vmatmul.msk.f32.gmra.mxu2 %vm39_vm0, %v90_v12 }
 0x186   :  { %v121_v14 = vpop.f32.mrf.mxu2 }
 0x187   :  { %v122_v15 = vadd.f32 %v169_v13, %v121_v14 }
 0x189   :  { %127 = vmax.xlane.f32.xlu0 %v122_v15 }
 0x18e   :  { %v124_v16 = vpop.f32.mrf.mxu2 }
 0x18f   :  { %v125_v17 = vadd.f32 %v169_v13, %v124_v16 }
 0x191   :  { %129 = vmax.xlane.f32.xlu0 %v125_v17 }
 0x1fc   :  { %v128_v18 = vpop.xlane.xlu0 %127 }
 0x1fd   :  { %v131_v19 = vsub.f32 %v122_v15, %v128_v18 }
 0x1ff   :  { %v133_v20 = vmul.f32 1.442695, %v131_v19 }
 0x201   :  { %170 = vpow2.f32 %v133_v20 }
 0x204   :  { %v130_v21 = vpop.xlane.xlu0 %129 }
 0x205   :  { %v132_v22 = vsub.f32 %v125_v17, %v130_v21 }
 0x207   :  { %v171_v23 = vpop.eup %170  ;;  %v135_v24 = vmul.f32 1.442695, %v132_v22 }
 0x208   :  { %137 = vadd.xlane.f32.xlu1 %v171_v23 }
 0x209   :  { %172 = vpow2.f32 %v135_v24 }
 0x20f   :  { %v173_v25 = vpop.eup %172 }
 0x210   :  { %139 = vadd.xlane.f32.xlu1 %v173_v25 }
 0x27b   :  { %v138_v26 = vpop.xlane.xlu1 %137 }
 0x27c   :  { %174 = vlog2.f32 %v138_v26 }
 0x282   :  { %v175_v27 = vpop.eup %174 }
 0x283   :  { %v142_v28 = vmul.f32 0.6931472, %v175_v27  ;;  %v140_v29 = vpop.xlane.xlu1 %139 }
 0x284   :  { %176 = vlog2.f32 %v140_v29 }
 0x285   :  { %v145_v30 = vsub.f32 %v131_v19, %v142_v28 }
 0x287   :  { %147 = vst [vmem:[%s254_s6] sm:$0xff] %v145_v30 }
 0x28a   :  { %v177_v31 = vpop.eup %176 }
 0x28b   :  { %v144_v32 = vmul.f32 0.6931472, %v177_v31 }
 0x28d   :  { %v146_v33 = vsub.f32 %v132_v22, %v144_v32 }
 0x28f   :  { %148 = vst [vmem:[%s254_s6 + $0x8] sm:$0xff] %v146_v33 }

// kernel: net_forward.3
= control target key start
LH: loop header
LB: loop body
LE: loop exit
PB: predicated region body
PF: predicated region fallthrough
CT: control target
= control target key end

     0   :  { %vm33_vm0 = vcmask 130048   ;;  %vm56_vm1 = vcmask 64512   ;;  %vm90_vm2 = vcmask 125952   ;;  %s154_s1 = inlined_call_operand.vmem [shape: bf16[16,8], index: 1, kind: input, shape index: {}]   ;;  %s155_s0 = inlined_call_operand.vmem [shape: bf16[16,16], index: 0, kind: input, shape index: {}]   ;;  %s156_s3 = inlined_call_operand.vmem [shape: f32[1,16], index: 3, kind: input, shape index: {}]   ;;  %s157_s2 = inlined_call_operand.vmem [shape: f32[8,16], index: 2, kind: input, shape index: {}]   ;;  %s158_s4 = inlined_call_operand.vmem [shape: bf16[16,16], index: 4, kind: output, shape index: {}]  }
   0x1   :  { %v109_v0 = vld [vmem:[%s154_s1] sm:$0xff] }
   0x2   :  { %v108_v1 = vld [vmem:[%s155_s0] sm:$0xff]  ;;  %44 = vmatpush.bf16.msra.mxu0 %v109_v0 }
   0x3   :  { %v51_v2 = vld [vmem:[%s157_s2] sm:$0xff] }
   0x4   :  { %78 = vmatpush.msra.mxu1 %v51_v2  ;;  %v110_v5 = vld [vmem:[%s156_s3] ss:$0 sm:$0xff] }
   0x5   :  { %105 = vmatmul.msk.bf16.vlgmr.msra.gmra.mxu0 %vm33_vm0, %v108_v1 }
  0x82   :  { %v46_v3 = vpop.f32.mrf.mxu0 }
  0x83   :  { %106 = vmatmul.msk.f32.vlgmr.msra.gmra.mxu1 %vm56_vm1, %v46_v3 }
  0x8a   :  { %v48_v4 = vpop.f32.mrf.mxu0 }
  0x8b   :  { %107 = vmatmul.msk.f32.gmra.mxu1 %vm56_vm1, %v48_v4 }
 0x100   :  { %v80_v6 = vpop.f32.mrf.mxu1 }
 0x101   :  { %v81_v7 = vadd.f32 %v110_v5, %v80_v6 }
 0x103   :  { %v86_v8 = vmax.f32 %v81_v7, 0.0 }
 0x105   :  { %v88_v9 = vpack.c.bf16 %v86_v8, %v86_v8 }
 0x107   :  { %91 = vst.msk [vmem:[%s158_s4] sm:$0xf] %vm90_vm2, %v88_v9 }
 0x108   :  { %v83_v10 = vpop.f32.mrf.mxu1 }
 0x109   :  { %v84_v11 = vadd.f32 %v110_v5, %v83_v10 }
 0x10b   :  { %v87_v12 = vmax.f32 %v84_v11, 0.0 }
 0x10d   :  { %v89_v13 = vpack.c.bf16 %v87_v12, %v87_v12 }
 0x10f   :  { %92 = vst.msk [vmem:[%s158_s4 + $0x4] sm:$0xf] %vm90_vm2, %v89_v13 }

</bundles_post_ra>
